<compile_context>
chip_gen: v6e
topology: v6e:2x2x1
jax: 0.10.0
libtpu: 0.0.40
codegen_flags: <defaults>
</compile_context>

<pallas_src>
import jax
import jax.numpy as jnp
import numpy as np
from jax import lax
from jax.experimental import pallas as pl
from jax.experimental.pallas import tpu as pltpu


def basic_block_kernel(x_ref, m1_ref, m2_ref, bias_ref, out_ref, mid_ref):
    """Fused BasicBlock for one batch element, lane-dense (H, W*C) layout.

    x_ref   : (1, H+2, WC)  row-padded input (zero halo rows), WC = W*C
    m1_ref  : (3, WC, WC)   conv1 band matrices (one per kh), BN1 scale folded
    m2_ref  : (3, WC, WC)   conv2 band matrices, BN2 scale folded
    bias_ref: (2, WC)       [bias1_tiled, bias2_tiled]
    out_ref : (1, H, WC)
    mid_ref : (H+2, WC)     VMEM scratch for conv2's row halo
    """
    H = out_ref.shape[1]
    WC = out_ref.shape[2]

    # Row-shifted, fully lane-dense views of the input (zero halo from wrapper).
    x_up = x_ref[0, 0:H, :]         # x[h-1]
    x_mid = x_ref[0, 1:H + 1, :]    # x[h]    (also the residual)
    x_dn = x_ref[0, 2:H + 2, :]     # x[h+1]

    # ---- conv1 (+ folded BN1 scale) as 3 lane-dense matmuls ----
    acc1 = jnp.dot(x_up, m1_ref[0], preferred_element_type=jnp.float32)
    acc1 = acc1 + jnp.dot(x_mid, m1_ref[1], preferred_element_type=jnp.float32)
    acc1 = acc1 + jnp.dot(x_dn, m1_ref[2], preferred_element_type=jnp.float32)

    # ---- BN1 bias + ReLU ----
    out1 = jnp.maximum(acc1 + bias_ref[0:1, :], 0.0)

    # Stage intermediate for conv2's H halo: only the two halo rows are
    # (re)zeroed, the interior is fully rewritten each step.
    zero_row = jnp.zeros((1, WC), jnp.float32)
    mid_ref[0:1, :] = zero_row
    mid_ref[H + 1:H + 2, :] = zero_row
    mid_ref[1:H + 1, :] = out1

    # ---- conv2 (+ folded BN2 scale) ----
    acc2 = jnp.dot(mid_ref[0:H, :], m2_ref[0],
                   preferred_element_type=jnp.float32)
    acc2 = acc2 + jnp.dot(out1, m2_ref[1], preferred_element_type=jnp.float32)
    acc2 = acc2 + jnp.dot(mid_ref[2:H + 2, :], m2_ref[2],
                          preferred_element_type=jnp.float32)

    # ---- BN2 bias + residual + ReLU, unmasked lane-dense store ----
    out2 = jnp.maximum(acc2 + bias_ref[1:2, :] + x_mid, 0.0)
    out_ref[...] = out2.reshape(1, H, WC)


def _conv3x3_band_matrices(w_hwio, W):
    """(3,3,C,C) HWIO conv weights -> (3, W*C, W*C) per-kh band matrices.

    M[kh, w_in*C+ci, w_out*C+co] = w[kh, w_in - w_out + 1, ci, co] when
    0 <= w_in - w_out + 1 <= 2, else 0.  The zero band realizes padding=1
    along W, so the kernel never needs masked loads/stores in W.
    """
    C = w_hwio.shape[2]
    w_in = jnp.arange(W)[:, None]
    w_out = jnp.arange(W)[None, :]
    kw = w_in - w_out + 1                                   # (W, W)
    valid = ((kw >= 0) & (kw <= 2)).astype(w_hwio.dtype)
    kw_idx = jnp.clip(kw, 0, 2)
    blocks = w_hwio[:, kw_idx]                              # (3, W, W, C, C)
    blocks = blocks * valid[None, :, :, None, None]
    # -> M[kh, w_in*C+ci, w_out*C+co]
    return blocks.transpose(0, 1, 3, 2, 4).reshape(3, W * C, W * C)


@jax.jit
def basic_block(x_nhwc, w1, w2, sb1, sb2):
    """x_nhwc: (N, H, W, C) f32; w*: (3,3,C,C) HWIO; sb*: (2, C) = (scale, bias)."""
    N, H, W, C = x_nhwc.shape
    WC = W * C

    # Weight preprocessing (wrapper-side, parameters only): band matrices with
    # BN scale folded into output columns, and lane-tiled biases.
    m1 = _conv3x3_band_matrices(w1, W) * jnp.tile(sb1[0], W)[None, None, :]
    m2 = _conv3x3_band_matrices(w2, W) * jnp.tile(sb2[0], W)[None, None, :]
    biases = jnp.stack([jnp.tile(sb1[1], W), jnp.tile(sb2[1], W)])  # (2, WC)

    # Lane-dense activations with a 2-row zero halo for the H direction.
    x_rows = jnp.pad(x_nhwc, ((0, 0), (1, 1), (0, 0), (0, 0)))
    x_rows = x_rows.reshape(N, H + 2, WC)

    out = pl.pallas_call(
        basic_block_kernel,
        out_shape=jax.ShapeDtypeStruct((N, H, WC), jnp.float32),
        grid_spec=pltpu.PrefetchScalarGridSpec(
            num_scalar_prefetch=0,
            grid=(N,),
            in_specs=[
                pl.BlockSpec((1, H + 2, WC), lambda n: (n, 0, 0)),
                pl.BlockSpec((3, WC, WC), lambda n: (0, 0, 0)),
                pl.BlockSpec((3, WC, WC), lambda n: (0, 0, 0)),
                pl.BlockSpec((2, WC), lambda n: (0, 0)),
            ],
            out_specs=pl.BlockSpec((1, H, WC), lambda n: (n, 0, 0)),
            scratch_shapes=[pltpu.VMEM((H + 2, WC), jnp.float32)],
        ),
        compiler_params=pltpu.CompilerParams(
            dimension_semantics=("parallel",)),
    )(x_rows, m1, m2, biases)

    return out.reshape(N, H, W, C)


def _fold_bn(gamma, beta, mean, var, eps=1e-5):
    scale = gamma / jnp.sqrt(var + eps)
    bias = beta - mean * scale
    return jnp.stack([scale, bias], axis=0)  # (2, C)


def _reference(x_nhwc, w1, w2, sb1, sb2):
    """Pure-JAX reference of the same forward pass."""
    dn = ('NHWC', 'HWIO', 'NHWC')
    out = lax.conv_general_dilated(x_nhwc, w1, (1, 1), 'SAME',
                                   dimension_numbers=dn)
    out = jnp.maximum(out * sb1[0] + sb1[1], 0.0)
    out = lax.conv_general_dilated(out, w2, (1, 1), 'SAME',
                                   dimension_numbers=dn)
    out = out * sb2[0] + sb2[1]
    return jnp.maximum(out + x_nhwc, 0.0)


if __name__ == "__main__":
    # BasicBlock(inplanes=8, planes=8, stride=1, downsample=None)
    N, C, H, W = 2, 8, 16, 16

    key = jax.random.PRNGKey(0)
    kx, kw1, kw2, kg1, kb1, kg2, kb2, km1, kv1, km2, kv2 = jax.random.split(key, 11)

    # Input is conceptually NCHW (PyTorch); transpose to NHWC for the kernel.
    x_nchw = jax.random.normal(kx, (N, C, H, W), jnp.float32)
    x_nhwc = jnp.transpose(x_nchw, (0, 2, 3, 1))

    # Conv weights in HWIO (PyTorch Conv2d weight is (O, I, kH, kW)).
    w1 = jax.random.normal(kw1, (3, 3, C, C), jnp.float32) * 0.1
    w2 = jax.random.normal(kw2, (3, 3, C, C), jnp.float32) * 0.1

    # BatchNorm (eval mode) parameters + running stats, deterministic.
    gamma1 = 1.0 + 0.1 * jax.random.normal(kg1, (C,), jnp.float32)
    beta1 = 0.1 * jax.random.normal(kb1, (C,), jnp.float32)
    mean1 = 0.1 * jax.random.normal(km1, (C,), jnp.float32)
    var1 = 1.0 + 0.1 * jax.random.uniform(kv1, (C,), jnp.float32)
    gamma2 = 1.0 + 0.1 * jax.random.normal(kg2, (C,), jnp.float32)
    beta2 = 0.1 * jax.random.normal(kb2, (C,), jnp.float32)
    mean2 = 0.1 * jax.random.normal(km2, (C,), jnp.float32)
    var2 = 1.0 + 0.1 * jax.random.uniform(kv2, (C,), jnp.float32)

    sb1 = _fold_bn(gamma1, beta1, mean1, var1)
    sb2 = _fold_bn(gamma2, beta2, mean2, var2)

    out = basic_block(x_nhwc, w1, w2, sb1, sb2)
    out = jax.block_until_ready(out)

    ref = _reference(x_nhwc, w1, w2, sb1, sb2)
    np.testing.assert_allclose(np.asarray(out), np.asarray(ref),
                               rtol=1e-3, atol=1e-3)

    print("KERNEL_OK")
</pallas_src>

<mosaic_0001>
module attributes {stable_mosaic.version = 11 : i64} {
  func.func @basic_block_kernel(%arg0: i32, %arg1: memref<1x18x128xf32, #tpu.memory_space<vmem>>, %arg2: memref<3x128x128xf32, #tpu.memory_space<vmem>>, %arg3: memref<3x128x128xf32, #tpu.memory_space<vmem>>, %arg4: memref<2x128xf32, #tpu.memory_space<vmem>>, %arg5: memref<1x16x128xf32, #tpu.memory_space<vmem>>, %arg6: memref<18x128xf32, #tpu.memory_space<vmem>>) attributes {dimension_semantics = [#tpu.dimension_semantics<parallel>], iteration_bounds = array<i64: 2>, scalar_prefetch = 0 : i64, scratch_operands = 1 : i64, tpu.core_type = #tpu.core_type<tc>, window_params = [{transform_indices = @transform_0, window_bounds = array<i64: 1, 18, 128>}, {pipeline_mode = #tpu.pipeline_mode<synchronous>, transform_indices = @transform_1, window_bounds = array<i64: 3, 128, 128>}, {pipeline_mode = #tpu.pipeline_mode<synchronous>, transform_indices = @transform_2, window_bounds = array<i64: 3, 128, 128>}, {pipeline_mode = #tpu.pipeline_mode<synchronous>, transform_indices = @transform_3, window_bounds = array<i64: 2, 128>}, {transform_indices = @transform_4, window_bounds = array<i64: 1, 16, 128>}]} {
    %c0 = arith.constant 0 : index
    %c0_0 = arith.constant 0 : index
    %c0_1 = arith.constant 0 : index
    %0 = vector.load %arg1[%c0, %c0_0, %c0_1] : memref<1x18x128xf32, #tpu.memory_space<vmem>>, vector<1x16x128xf32>
    %1 = vector.shape_cast %0 : vector<1x16x128xf32> to vector<16x128xf32>
    %c0_2 = arith.constant 0 : index
    %c1 = arith.constant 1 : index
    %c0_3 = arith.constant 0 : index
    %2 = vector.load %arg1[%c0_2, %c1, %c0_3] : memref<1x18x128xf32, #tpu.memory_space<vmem>>, vector<1x16x128xf32>
    %3 = vector.shape_cast %2 : vector<1x16x128xf32> to vector<16x128xf32>
    %c0_4 = arith.constant 0 : index
    %c2 = arith.constant 2 : index
    %c0_5 = arith.constant 0 : index
    %4 = vector.load %arg1[%c0_4, %c2, %c0_5] : memref<1x18x128xf32, #tpu.memory_space<vmem>>, vector<1x16x128xf32>
    %5 = vector.shape_cast %4 : vector<1x16x128xf32> to vector<16x128xf32>
    %c0_6 = arith.constant 0 : index
    %c0_7 = arith.constant 0 : index
    %c0_8 = arith.constant 0 : index
    %6 = vector.load %arg2[%c0_6, %c0_7, %c0_8] : memref<3x128x128xf32, #tpu.memory_space<vmem>>, vector<1x128x128xf32>
    %7 = vector.shape_cast %6 : vector<1x128x128xf32> to vector<128x128xf32>
    %cst = arith.constant dense<0.000000e+00> : vector<16x128xf32>
    %8 = tpu.matmul %1, %7, %cst {dimension_numbers = #tpu.dot_dimension_numbers<[1], [0], [0], [1], [0, 0, 1, 1], [], []>} : vector<16x128xf32>, vector<128x128xf32>, vector<16x128xf32> -> vector<16x128xf32>
    %c1_9 = arith.constant 1 : index
    %c0_10 = arith.constant 0 : index
    %c0_11 = arith.constant 0 : index
    %9 = vector.load %arg2[%c1_9, %c0_10, %c0_11] : memref<3x128x128xf32, #tpu.memory_space<vmem>>, vector<1x128x128xf32>
    %10 = vector.shape_cast %9 : vector<1x128x128xf32> to vector<128x128xf32>
    %cst_12 = arith.constant dense<0.000000e+00> : vector<16x128xf32>
    %11 = tpu.matmul %3, %10, %cst_12 {dimension_numbers = #tpu.dot_dimension_numbers<[1], [0], [0], [1], [0, 0, 1, 1], [], []>} : vector<16x128xf32>, vector<128x128xf32>, vector<16x128xf32> -> vector<16x128xf32>
    %12 = arith.addf %8, %11 : vector<16x128xf32>
    %c2_13 = arith.constant 2 : index
    %c0_14 = arith.constant 0 : index
    %c0_15 = arith.constant 0 : index
    %13 = vector.load %arg2[%c2_13, %c0_14, %c0_15] : memref<3x128x128xf32, #tpu.memory_space<vmem>>, vector<1x128x128xf32>
    %14 = vector.shape_cast %13 : vector<1x128x128xf32> to vector<128x128xf32>
    %cst_16 = arith.constant dense<0.000000e+00> : vector<16x128xf32>
    %15 = tpu.matmul %5, %14, %cst_16 {dimension_numbers = #tpu.dot_dimension_numbers<[1], [0], [0], [1], [0, 0, 1, 1], [], []>} : vector<16x128xf32>, vector<128x128xf32>, vector<16x128xf32> -> vector<16x128xf32>
    %16 = arith.addf %12, %15 : vector<16x128xf32>
    %c0_17 = arith.constant 0 : index
    %c0_18 = arith.constant 0 : index
    %17 = vector.load %arg4[%c0_17, %c0_18] : memref<2x128xf32, #tpu.memory_space<vmem>>, vector<1x128xf32>
    %18 = vector.broadcast %17 : vector<1x128xf32> to vector<16x128xf32>
    %19 = arith.addf %16, %18 : vector<16x128xf32>
    %cst_19 = arith.constant 0.000000e+00 : f32
    %20 = vector.broadcast %cst_19 : f32 to vector<16x128xf32>
    %21 = arith.maximumf %19, %20 : vector<16x128xf32>
    %cst_20 = arith.constant 0.000000e+00 : f32
    %22 = vector.broadcast %cst_20 : f32 to vector<1x128xf32>
    %c0_21 = arith.constant 0 : index
    %c0_22 = arith.constant 0 : index
    %23 = vector.load %arg6[%c0_21, %c0_22] : memref<18x128xf32, #tpu.memory_space<vmem>>, vector<1x128xf32>
    tpu.vector_store %arg6[%c0_21, %c0_22], %22 {strides = array<i32>} : memref<18x128xf32, #tpu.memory_space<vmem>>, vector<1x128xf32>,
    %c17 = arith.constant 17 : index
    %c0_23 = arith.constant 0 : index
    %24 = vector.load %arg6[%c17, %c0_23] : memref<18x128xf32, #tpu.memory_space<vmem>>, vector<1x128xf32>
    tpu.vector_store %arg6[%c17, %c0_23], %22 {strides = array<i32>} : memref<18x128xf32, #tpu.memory_space<vmem>>, vector<1x128xf32>,
    %c1_24 = arith.constant 1 : index
    %c0_25 = arith.constant 0 : index
    %25 = vector.load %arg6[%c1_24, %c0_25] : memref<18x128xf32, #tpu.memory_space<vmem>>, vector<16x128xf32>
    tpu.vector_store %arg6[%c1_24, %c0_25], %21 {strides = array<i32>} : memref<18x128xf32, #tpu.memory_space<vmem>>, vector<16x128xf32>,
    %c0_26 = arith.constant 0 : index
    %c0_27 = arith.constant 0 : index
    %26 = vector.load %arg6[%c0_26, %c0_27] : memref<18x128xf32, #tpu.memory_space<vmem>>, vector<16x128xf32>
    %c0_28 = arith.constant 0 : index
    %c0_29 = arith.constant 0 : index
    %c0_30 = arith.constant 0 : index
    %27 = vector.load %arg3[%c0_28, %c0_29, %c0_30] : memref<3x128x128xf32, #tpu.memory_space<vmem>>, vector<1x128x128xf32>
    %28 = vector.shape_cast %27 : vector<1x128x128xf32> to vector<128x128xf32>
    %cst_31 = arith.constant dense<0.000000e+00> : vector<16x128xf32>
    %29 = tpu.matmul %26, %28, %cst_31 {dimension_numbers = #tpu.dot_dimension_numbers<[1], [0], [0], [1], [0, 0, 1, 1], [], []>} : vector<16x128xf32>, vector<128x128xf32>, vector<16x128xf32> -> vector<16x128xf32>
    %c1_32 = arith.constant 1 : index
    %c0_33 = arith.constant 0 : index
    %c0_34 = arith.constant 0 : index
    %30 = vector.load %arg3[%c1_32, %c0_33, %c0_34] : memref<3x128x128xf32, #tpu.memory_space<vmem>>, vector<1x128x128xf32>
    %31 = vector.shape_cast %30 : vector<1x128x128xf32> to vector<128x128xf32>
    %cst_35 = arith.constant dense<0.000000e+00> : vector<16x128xf32>
    %32 = tpu.matmul %21, %31, %cst_35 {dimension_numbers = #tpu.dot_dimension_numbers<[1], [0], [0], [1], [0, 0, 1, 1], [], []>} : vector<16x128xf32>, vector<128x128xf32>, vector<16x128xf32> -> vector<16x128xf32>
    %33 = arith.addf %29, %32 : vector<16x128xf32>
    %c2_36 = arith.constant 2 : index
    %c0_37 = arith.constant 0 : index
    %34 = vector.load %arg6[%c2_36, %c0_37] : memref<18x128xf32, #tpu.memory_space<vmem>>, vector<16x128xf32>
    %c2_38 = arith.constant 2 : index
    %c0_39 = arith.constant 0 : index
    %c0_40 = arith.constant 0 : index
    %35 = vector.load %arg3[%c2_38, %c0_39, %c0_40] : memref<3x128x128xf32, #tpu.memory_space<vmem>>, vector<1x128x128xf32>
    %36 = vector.shape_cast %35 : vector<1x128x128xf32> to vector<128x128xf32>
    %cst_41 = arith.constant dense<0.000000e+00> : vector<16x128xf32>
    %37 = tpu.matmul %34, %36, %cst_41 {dimension_numbers = #tpu.dot_dimension_numbers<[1], [0], [0], [1], [0, 0, 1, 1], [], []>} : vector<16x128xf32>, vector<128x128xf32>, vector<16x128xf32> -> vector<16x128xf32>
    %38 = arith.addf %33, %37 : vector<16x128xf32>
    %c1_42 = arith.constant 1 : index
    %c0_43 = arith.constant 0 : index
    %39 = vector.load %arg4[%c1_42, %c0_43] : memref<2x128xf32, #tpu.memory_space<vmem>>, vector<1x128xf32>
    %40 = vector.broadcast %39 : vector<1x128xf32> to vector<16x128xf32>
    %41 = arith.addf %38, %40 : vector<16x128xf32>
    %42 = arith.addf %41, %3 : vector<16x128xf32>
    %cst_44 = arith.constant 0.000000e+00 : f32
    %43 = vector.broadcast %cst_44 : f32 to vector<16x128xf32>
    %44 = arith.maximumf %42, %43 : vector<16x128xf32>
    %45 = vector.shape_cast %44 : vector<16x128xf32> to vector<1x16x128xf32>
    %c0_45 = arith.constant 0 : index
    %c0_46 = arith.constant 0 : index
    %c0_47 = arith.constant 0 : index
    %46 = vector.load %arg5[%c0_45, %c0_46, %c0_47] : memref<1x16x128xf32, #tpu.memory_space<vmem>>, vector<1x16x128xf32>
    tpu.vector_store %arg5[%c0_45, %c0_46, %c0_47], %45 {strides = array<i32>} : memref<1x16x128xf32, #tpu.memory_space<vmem>>, vector<1x16x128xf32>,
    return
  }
  func.func @transform_0(%arg0: i32) -> (i32, i32, i32) {
    %c0_i32 = arith.constant 0 : i32
    %c0_i32_0 = arith.constant 0 : i32
    %c0_i32_1 = arith.constant 0 : i32
    return %arg0, %c0_i32, %c0_i32_0 : i32, i32, i32
  }
  func.func @transform_1(%arg0: i32) -> (i32, i32, i32) {
    %c0_i32 = arith.constant 0 : i32
    %c0_i32_0 = arith.constant 0 : i32
    %c0_i32_1 = arith.constant 0 : i32
    %c0_i32_2 = arith.constant 0 : i32
    return %c0_i32, %c0_i32_0, %c0_i32_1 : i32, i32, i32
  }
  func.func @transform_2(%arg0: i32) -> (i32, i32, i32) {
    %c0_i32 = arith.constant 0 : i32
    %c0_i32_0 = arith.constant 0 : i32
    %c0_i32_1 = arith.constant 0 : i32
    %c0_i32_2 = arith.constant 0 : i32
    return %c0_i32, %c0_i32_0, %c0_i32_1 : i32, i32, i32
  }
  func.func @transform_3(%arg0: i32) -> (i32, i32) {
    %c0_i32 = arith.constant 0 : i32
    %c0_i32_0 = arith.constant 0 : i32
    %c0_i32_1 = arith.constant 0 : i32
    return %c0_i32, %c0_i32_0 : i32, i32
  }
  func.func @transform_4(%arg0: i32) -> (i32, i32, i32) {
    %c0_i32 = arith.constant 0 : i32
    %c0_i32_0 = arith.constant 0 : i32
    %c0_i32_1 = arith.constant 0 : i32
    return %arg0, %c0_i32, %c0_i32_0 : i32, i32, i32
  }
}

</mosaic_0001>

<bundles_post_ra>
// kernel: tile.18
= control target key start
LH: loop header
LB: loop body
LE: loop exit
PB: predicated region body
PF: predicated region fallthrough
CT: control target
= control target key end

     0   :  { %s28_s0 = inlined_call_operand.vmem [shape: f32[8], index: 0, kind: input, shape index: {}]   ;;  %s29_s1 = inlined_call_operand.vmem [shape: f32[16,8], index: 1, kind: output, shape index: {}]  }
   0x1   :  { %v4_v0 = vld [vmem:[%s28_s0] ss:$0 sm:$0xff] }
   0x2   :  { %5 = vst [vmem:[%s29_s1] sm:$0xff] %v4_v0  ;;  %8 = vst [vmem:[%s29_s1 + $0x8] sm:$0xff] %v4_v0 }

// kernel: mul.21
= control target key start
LH: loop header
LB: loop body
LE: loop exit
PB: predicated region body
PF: predicated region fallthrough
CT: control target
= control target key end

     0   :  { %s133_s10 = smov 120   ;;  %s134_s11 = smov 104   ;;  %vm3_vm0 = vcmask 64512   ;;  %vm9_vm1 = vcmask 1048512   ;;  %vm15_vm2 = vcmask 982912   ;;  %vm21_vm3 = vcmask 917312   ;;  %s209_s0 = inlined_call_operand.vmem [shape: f32[16,8], index: 0, kind: input, shape index: {}]   ;;  %s210_s1 = inlined_call_operand.vmem [shape: f32[128], index: 1, kind: output, shape index: {}]  }
   0x1   :  { %v103_v0 = vld [vmem:[%s209_s0 + $0xf] sm:$0x1]   ;;  %v105_v1 = vld [vmem:[%s209_s0 + $0xd] sm:$0x1]   ;;  %v104_v2 = vld [vmem:[%s209_s0 + $0xe] sm:$0x1]  }
   0x2   :  { %7 = vrot.lane.b32.xlu0 %v103_v0, %s133_s10  ;;  %19 = vrot.lane.b32.xlu1 %v105_v1, %s134_s11  ;;  %v106_v3 = vld [vmem:[%s209_s0 + $0xc] sm:$0x1]   ;;  %s135_s16 = smov 112   ;;  %s136_s17 = smov 96   ;;  %v107_v4 = vld [vmem:[%s209_s0 + $0xb] sm:$0x1]  }
   0x3   :  { %v108_v5 = vld [vmem:[%s209_s0 + $0xa] sm:$0x1]   ;;  %v2_v6 = vld [vmem:[%s209_s0] sm:$0x1]   ;;  %s137_s24 = smov 88   ;;  %s138_s25 = smov 80  }
   0x4   :  { %4 = vst.msk [vmem:[#allocation0] sm:$0x1] %vm3_vm0, %v2_v6   ;;  %v109_v7 = vld [vmem:[%s209_s0 + $0x9] sm:$0x1]   ;;  %v110_v8 = vld [vmem:[%s209_s0 + $0x8] sm:$0x1]  }
   0x5   :  { %s139_s30 = smov 72   ;;  %s140_s2 = smov 64   ;;  %v111_v9 = vld [vmem:[%s209_s0 + $0x7] sm:$0x1]   ;;  %v112_v10 = vld [vmem:[%s209_s0 + $0x6] sm:$0x1]  }
   0x6   :  { %13 = vrot.lane.b32.xlu0 %v104_v2, %s135_s16  ;;  %25 = vrot.lane.b32.xlu1 %v106_v3, %s136_s17  ;;  %s141_s7 = smov 56   ;;  %s142_s8 = smov 48   ;;  %v113_v11 = vld [vmem:[%s209_s0 + $0x5] sm:$0x1]   ;;  %v114_v12 = vld [vmem:[%s209_s0 + $0x4] sm:$0x1]  }
   0x7   :  { %s143_s13 = smov 40   ;;  %s144_s14 = smov 32   ;;  %v115_v13 = vld [vmem:[%s209_s0 + $0x3] sm:$0x1]   ;;  %v116_v14 = vld [vmem:[%s209_s0 + $0x2] sm:$0x1]  }
   0x8   :  { %s145_s19 = smov 24   ;;  %s146_s20 = smov 16   ;;  %v117_v15 = vld [vmem:[%s209_s0 + $0x1] sm:$0x1]   ;;  %vm27_vm4 = vcmask 851712   ;;  %vm33_vm5 = vcmask 786112  }
   0x9   :  { %s147_s0 = smov 8   ;;  %vm39_vm6 = vcmask 720512   ;;  %vm45_vm7 = vcmask 654912   ;;  %vm51_vm8 = vcmask 589312   ;;  %vm57_vm9 = vcmask 523712  }
   0xa   :  { %31 = vrot.lane.b32.xlu0 %v107_v4, %s137_s24  ;;  %37 = vrot.lane.b32.xlu1 %v108_v5, %s138_s25  ;;  %vm63_vm10 = vcmask 458112   ;;  %vm69_vm11 = vcmask 392512   ;;  %vm75_vm12 = vcmask 326912   ;;  %vm81_vm13 = vcmask 261312  }
   0xb   :  { %vm87_vm14 = vcmask 195712   ;;  %vm93_vm15 = vcmask 130112  }
   0xe   :  { %43 = vrot.lane.b32.xlu0 %v109_v7, %s139_s30  ;;  %49 = vrot.lane.b32.xlu1 %v110_v8, %s140_s2 }
  0x12   :  { %55 = vrot.lane.b32.xlu0 %v111_v9, %s141_s7  ;;  %61 = vrot.lane.b32.xlu1 %v112_v10, %s142_s8 }
  0x16   :  { %67 = vrot.lane.b32.xlu0 %v113_v11, %s143_s13  ;;  %73 = vrot.lane.b32.xlu1 %v114_v12, %s144_s14 }
  0x1a   :  { %79 = vrot.lane.b32.xlu0 %v115_v13, %s145_s19  ;;  %85 = vrot.lane.b32.xlu1 %v116_v14, %s146_s20 }
  0x1e   :  { %91 = vrot.lane.b32.xlu0 %v117_v15, %s147_s0 }
  0x74   :  { %v8_v16 = vpop.permute.xlu0 %7   ;;  %v20_v17 = vpop.permute.xlu1 %19  }
  0x75   :  { %10 = vst.msk [vmem:[#allocation0] sm:$0x1] %vm9_vm1, %v8_v16  }
  0x78   :  { %v14_v18 = vpop.permute.xlu0 %13   ;;  %v26_v19 = vpop.permute.xlu1 %25  }
  0x79   :  { %16 = vst.msk [vmem:[#allocation0] sm:$0x1] %vm15_vm2, %v14_v18  }
  0x7a   :  { %22 = vst.msk [vmem:[#allocation0] sm:$0x1] %vm21_vm3, %v20_v17  }
  0x7b   :  { %28 = vst.msk [vmem:[#allocation0] sm:$0x1] %vm27_vm4, %v26_v19  }
  0x7c   :  { %v32_v20 = vpop.permute.xlu0 %31   ;;  %v38_v21 = vpop.permute.xlu1 %37  }
  0x7d   :  { %34 = vst.msk [vmem:[#allocation0] sm:$0x1] %vm33_vm5, %v32_v20  }
  0x7e   :  { %40 = vst.msk [vmem:[#allocation0] sm:$0x1] %vm39_vm6, %v38_v21  }
  0x80   :  { %v44_v22 = vpop.permute.xlu0 %43   ;;  %v50_v23 = vpop.permute.xlu1 %49  }
  0x81   :  { %46 = vst.msk [vmem:[#allocation0] sm:$0x1] %vm45_vm7, %v44_v22  }
  0x82   :  { %52 = vst.msk [vmem:[#allocation0] sm:$0x1] %vm51_vm8, %v50_v23  }
  0x84   :  { %v56_v24 = vpop.permute.xlu0 %55   ;;  %v62_v25 = vpop.permute.xlu1 %61  }
  0x85   :  { %58 = vst.msk [vmem:[#allocation0] sm:$0x1] %vm57_vm9, %v56_v24  }
  0x86   :  { %64 = vst.msk [vmem:[#allocation0] sm:$0x1] %vm63_vm10, %v62_v25  }
  0x88   :  { %v68_v26 = vpop.permute.xlu0 %67   ;;  %v74_v27 = vpop.permute.xlu1 %73  }
  0x89   :  { %70 = vst.msk [vmem:[#allocation0] sm:$0x1] %vm69_vm11, %v68_v26  }
  0x8a   :  { %76 = vst.msk [vmem:[#allocation0] sm:$0x1] %vm75_vm12, %v74_v27  }
  0x8c   :  { %v80_v28 = vpop.permute.xlu0 %79   ;;  %v86_v29 = vpop.permute.xlu1 %85  }
  0x8d   :  { %82 = vst.msk [vmem:[#allocation0] sm:$0x1] %vm81_vm13, %v80_v28  }
  0x8e   :  { %88 = vst.msk [vmem:[#allocation0] sm:$0x1] %vm87_vm14, %v86_v29  }
  0x90   :  { %v92_v30 = vpop.permute.xlu0 %91  }
  0x91   :  { %94 = vst.msk [vmem:[#allocation0] sm:$0x1] %vm93_vm15, %v92_v30  }
  0x98   :  { %v99_v31 = vld [vmem:[#allocation0] sm:$0x1] }
  0x99   :  { %102 = vst [vmem:[%s210_s1] sm:$0x1] %v99_v31 }

// kernel: tile.30
= control target key start
LH: loop header
LB: loop body
LE: loop exit
PB: predicated region body
PF: predicated region fallthrough
CT: control target
= control target key end

     0   :  { %s133_s10 = smov 120   ;;  %s134_s11 = smov 104   ;;  %vm3_vm0 = vcmask 64512   ;;  %vm9_vm1 = vcmask 1048512   ;;  %vm15_vm2 = vcmask 982912   ;;  %vm21_vm3 = vcmask 917312   ;;  %s209_s0 = inlined_call_operand.vmem [shape: f32[16,8], index: 0, kind: input, shape index: {}]   ;;  %s210_s1 = inlined_call_operand.vmem [shape: f32[1,128], index: 1, kind: output, shape index: {}]  }
   0x1   :  { %v103_v0 = vld [vmem:[%s209_s0 + $0xf] sm:$0x1]   ;;  %v105_v1 = vld [vmem:[%s209_s0 + $0xd] sm:$0x1]   ;;  %v104_v2 = vld [vmem:[%s209_s0 + $0xe] sm:$0x1]  }
   0x2   :  { %7 = vrot.lane.b32.xlu0 %v103_v0, %s133_s10  ;;  %19 = vrot.lane.b32.xlu1 %v105_v1, %s134_s11  ;;  %v106_v3 = vld [vmem:[%s209_s0 + $0xc] sm:$0x1]   ;;  %s135_s16 = smov 112   ;;  %s136_s17 = smov 96   ;;  %v107_v4 = vld [vmem:[%s209_s0 + $0xb] sm:$0x1]  }
   0x3   :  { %v108_v5 = vld [vmem:[%s209_s0 + $0xa] sm:$0x1]   ;;  %v2_v6 = vld [vmem:[%s209_s0] sm:$0x1]   ;;  %s137_s24 = smov 88   ;;  %s138_s25 = smov 80  }
   0x4   :  { %4 = vst.msk [vmem:[#allocation0] sm:$0x1] %vm3_vm0, %v2_v6   ;;  %v109_v7 = vld [vmem:[%s209_s0 + $0x9] sm:$0x1]   ;;  %v110_v8 = vld [vmem:[%s209_s0 + $0x8] sm:$0x1]  }
   0x5   :  { %s139_s30 = smov 72   ;;  %s140_s2 = smov 64   ;;  %v111_v9 = vld [vmem:[%s209_s0 + $0x7] sm:$0x1]   ;;  %v112_v10 = vld [vmem:[%s209_s0 + $0x6] sm:$0x1]  }
   0x6   :  { %13 = vrot.lane.b32.xlu0 %v104_v2, %s135_s16  ;;  %25 = vrot.lane.b32.xlu1 %v106_v3, %s136_s17  ;;  %s141_s7 = smov 56   ;;  %s142_s8 = smov 48   ;;  %v113_v11 = vld [vmem:[%s209_s0 + $0x5] sm:$0x1]   ;;  %v114_v12 = vld [vmem:[%s209_s0 + $0x4] sm:$0x1]  }
   0x7   :  { %s143_s13 = smov 40   ;;  %s144_s14 = smov 32   ;;  %v115_v13 = vld [vmem:[%s209_s0 + $0x3] sm:$0x1]   ;;  %v116_v14 = vld [vmem:[%s209_s0 + $0x2] sm:$0x1]  }
   0x8   :  { %s145_s19 = smov 24   ;;  %s146_s20 = smov 16   ;;  %v117_v15 = vld [vmem:[%s209_s0 + $0x1] sm:$0x1]   ;;  %vm27_vm4 = vcmask 851712   ;;  %vm33_vm5 = vcmask 786112  }
   0x9   :  { %s147_s0 = smov 8   ;;  %vm39_vm6 = vcmask 720512   ;;  %vm45_vm7 = vcmask 654912   ;;  %vm51_vm8 = vcmask 589312   ;;  %vm57_vm9 = vcmask 523712  }
   0xa   :  { %31 = vrot.lane.b32.xlu0 %v107_v4, %s137_s24  ;;  %37 = vrot.lane.b32.xlu1 %v108_v5, %s138_s25  ;;  %vm63_vm10 = vcmask 458112   ;;  %vm69_vm11 = vcmask 392512   ;;  %vm75_vm12 = vcmask 326912   ;;  %vm81_vm13 = vcmask 261312  }
   0xb   :  { %vm87_vm14 = vcmask 195712   ;;  %vm93_vm15 = vcmask 130112  }
   0xe   :  { %43 = vrot.lane.b32.xlu0 %v109_v7, %s139_s30  ;;  %49 = vrot.lane.b32.xlu1 %v110_v8, %s140_s2 }
  0x12   :  { %55 = vrot.lane.b32.xlu0 %v111_v9, %s141_s7  ;;  %61 = vrot.lane.b32.xlu1 %v112_v10, %s142_s8 }
  0x16   :  { %67 = vrot.lane.b32.xlu0 %v113_v11, %s143_s13  ;;  %73 = vrot.lane.b32.xlu1 %v114_v12, %s144_s14 }
  0x1a   :  { %79 = vrot.lane.b32.xlu0 %v115_v13, %s145_s19  ;;  %85 = vrot.lane.b32.xlu1 %v116_v14, %s146_s20 }
  0x1e   :  { %91 = vrot.lane.b32.xlu0 %v117_v15, %s147_s0 }
  0x74   :  { %v8_v16 = vpop.permute.xlu0 %7   ;;  %v20_v17 = vpop.permute.xlu1 %19  }
  0x75   :  { %10 = vst.msk [vmem:[#allocation0] sm:$0x1] %vm9_vm1, %v8_v16  }
  0x78   :  { %v14_v18 = vpop.permute.xlu0 %13   ;;  %v26_v19 = vpop.permute.xlu1 %25  }
  0x79   :  { %16 = vst.msk [vmem:[#allocation0] sm:$0x1] %vm15_vm2, %v14_v18  }
  0x7a   :  { %22 = vst.msk [vmem:[#allocation0] sm:$0x1] %vm21_vm3, %v20_v17  }
  0x7b   :  { %28 = vst.msk [vmem:[#allocation0] sm:$0x1] %vm27_vm4, %v26_v19  }
  0x7c   :  { %v32_v20 = vpop.permute.xlu0 %31   ;;  %v38_v21 = vpop.permute.xlu1 %37  }
  0x7d   :  { %34 = vst.msk [vmem:[#allocation0] sm:$0x1] %vm33_vm5, %v32_v20  }
  0x7e   :  { %40 = vst.msk [vmem:[#allocation0] sm:$0x1] %vm39_vm6, %v38_v21  }
  0x80   :  { %v44_v22 = vpop.permute.xlu0 %43   ;;  %v50_v23 = vpop.permute.xlu1 %49  }
  0x81   :  { %46 = vst.msk [vmem:[#allocation0] sm:$0x1] %vm45_vm7, %v44_v22  }
  0x82   :  { %52 = vst.msk [vmem:[#allocation0] sm:$0x1] %vm51_vm8, %v50_v23  }
  0x84   :  { %v56_v24 = vpop.permute.xlu0 %55   ;;  %v62_v25 = vpop.permute.xlu1 %61  }
  0x85   :  { %58 = vst.msk [vmem:[#allocation0] sm:$0x1] %vm57_vm9, %v56_v24  }
  0x86   :  { %64 = vst.msk [vmem:[#allocation0] sm:$0x1] %vm63_vm10, %v62_v25  }
  0x88   :  { %v68_v26 = vpop.permute.xlu0 %67   ;;  %v74_v27 = vpop.permute.xlu1 %73  }
  0x89   :  { %70 = vst.msk [vmem:[#allocation0] sm:$0x1] %vm69_vm11, %v68_v26  }
  0x8a   :  { %76 = vst.msk [vmem:[#allocation0] sm:$0x1] %vm75_vm12, %v74_v27  }
  0x8c   :  { %v80_v28 = vpop.permute.xlu0 %79   ;;  %v86_v29 = vpop.permute.xlu1 %85  }
  0x8d   :  { %82 = vst.msk [vmem:[#allocation0] sm:$0x1] %vm81_vm13, %v80_v28  }
  0x8e   :  { %88 = vst.msk [vmem:[#allocation0] sm:$0x1] %vm87_vm14, %v86_v29  }
  0x90   :  { %v92_v30 = vpop.permute.xlu0 %91  }
  0x91   :  { %94 = vst.msk [vmem:[#allocation0] sm:$0x1] %vm93_vm15, %v92_v30  }
  0x98   :  { %v99_v31 = vld [vmem:[#allocation0] sm:$0x1] }
  0x99   :  { %102 = vst [vmem:[%s210_s1] sm:$0x1] %v99_v31 }

// kernel: basic_block.1
= control target key start
LH: loop header
LB: loop body
LE: loop exit
PB: predicated region body
PF: predicated region fallthrough
CT: control target
= control target key end

     0   :  { %s1282_s15 = smov 0   ;;  %s1617_s0 = inlined_call_operand.vmem [shape: f32[2,18,128], index: 0, kind: input, shape index: {}]   ;;  %s1618_s1 = inlined_call_operand.vmem [shape: f32[3,128,128], index: 1, kind: input, shape index: {}]   ;;  %s1619_s2 = inlined_call_operand.vmem [shape: f32[3,128,128], index: 2, kind: input, shape index: {}]   ;;  %s1620_s3 = inlined_call_operand.vmem [shape: f32[2,128], index: 3, kind: input, shape index: {}]   ;;  %s1621_s4 = inlined_call_operand.vmem [shape: f32[2,16,128], index: 4, kind: output, shape index: {}]  }
   0x1 LB: > { %s843_s16 = sadd.s32 4294967295, %s1254_s15   ;;  %p847_p0 = scmp.ge.s32.totalorder %s1254_s15, 1  ;;  %s1254_s15 = sphi %s1282_s15, %s14_s15  }
   0x2   : > { %p162_p1 = scmp.lt.s32.totalorder %s1254_s15, 3 }
   0x4   : > { %p163_p2 = pnand %p847_p0, %p162_p1 }
   0x5   : > { %p188_p3 = scmp.lt.s32.totalorder (!%p163_p2), %s843_s16, 1 }
   0x6   : > { %166 = sbr.rel (%p163_p2) target bundleno = 516 (0x204), region = 36 }
   0xb   : > { %v866_v0 = vld [vmem:[%s1618_s1 + $0xf8] sm:$0xff]  ;;  %v865_v2 = vld [vmem:[%s1618_s1 + $0xf0] sm:$0xff]  ;;  %v864_v4 = vld [vmem:[%s1618_s1 + $0xe8] sm:$0xff]  ;;  %s1623_s16 = smov (!%p188_p3, %s843_s16), 1 }
   0xc   : > { %v219_v1 = vld [vmem:[%s1618_s1 + $0x78] sm:$0xff]  ;;  %1028 = vmatprep.subr.mxu0 %v866_v0  ;;  %v218_v3 = vld [vmem:[%s1618_s1 + $0x70] sm:$0xff]  ;;  %v217_v5 = vld [vmem:[%s1618_s1 + $0x68] sm:$0xff]  ;;  %s1238_s21 = smul.u32 24, %s1623_s16  ;;  %s919_s26 = sshll.u32 %s1623_s16, 4 }
   0xd   : > { %1063 = vmatprep.subr.mxu1 %v219_v1  ;;  %1029 = vmatpush3.msra.mxu0 %v866_v0  ;;  %v863_v6 = vld [vmem:[%s1618_s1 + $0xe0] sm:$0xff]  ;;  %v862_v8 = vld [vmem:[%s1618_s1 + $0xd8] sm:$0xff]  ;;  %v861_v10 = vld [vmem:[%s1618_s1 + $0xd0] sm:$0xff]  ;;  %s197_s29 = scalar_lea.vmem %s1621_s4, %s919_s26 }
   0xe   : > { %1064 = vmatpush3.msra.mxu1 %v219_v1  ;;  %1030 = vmatprep.subr.mxu0 %v865_v2  ;;  %v216_v7 = vld [vmem:[%s1618_s1 + $0x60] sm:$0xff]  ;;  %v215_v9 = vld [vmem:[%s1618_s1 + $0x58] sm:$0xff]  ;;  %v214_v11 = vld [vmem:[%s1618_s1 + $0x50] sm:$0xff]  ;;  %s1390_s6 = scalar_lea.vmem %s1617_s0, %s1238_s21 }
   0xf   : > { %1065 = vmatprep.subr.mxu1 %v218_v3  ;;  %1031 = vmatpush3.msra.mxu0 %v865_v2  ;;  %v860_v12 = vld [vmem:[%s1618_s1 + $0xc8] sm:$0xff]  ;;  %v859_v14 = vld [vmem:[%s1618_s1 + $0xc0] sm:$0xff]  ;;  %v858_v16 = vld [vmem:[%s1618_s1 + $0xb8] sm:$0xff] }
  0x10   : > { %1066 = vmatpush3.msra.mxu1 %v218_v3  ;;  %1032 = vmatprep.subr.mxu0 %v864_v4  ;;  %v213_v13 = vld [vmem:[%s1618_s1 + $0x48] sm:$0xff]  ;;  %v212_v15 = vld [vmem:[%s1618_s1 + $0x40] sm:$0xff]  ;;  %v211_v17 = vld [vmem:[%s1618_s1 + $0x38] sm:$0xff] }
  0x11   : > { %1067 = vmatprep.subr.mxu1 %v217_v5  ;;  %1033 = vmatpush3.msra.mxu0 %v864_v4  ;;  %v857_v18 = vld [vmem:[%s1618_s1 + $0xb0] sm:$0xff]  ;;  %v856_v20 = vld [vmem:[%s1618_s1 + $0xa8] sm:$0xff]  ;;  %v855_v22 = vld [vmem:[%s1618_s1 + $0xa0] sm:$0xff] }
  0x12   : > { %1068 = vmatpush3.msra.mxu1 %v217_v5  ;;  %1034 = vmatprep.subr.mxu0 %v863_v6  ;;  %v210_v19 = vld [vmem:[%s1618_s1 + $0x30] sm:$0xff]  ;;  %v209_v21 = vld [vmem:[%s1618_s1 + $0x28] sm:$0xff]  ;;  %v208_v23 = vld [vmem:[%s1618_s1 + $0x20] sm:$0xff] }
  0x13   : > { %1069 = vmatprep.subr.mxu1 %v216_v7  ;;  %1035 = vmatpush3.msra.mxu0 %v863_v6  ;;  %v854_v24 = vld [vmem:[%s1618_s1 + $0x98] sm:$0xff]  ;;  %v853_v26 = vld [vmem:[%s1618_s1 + $0x90] sm:$0xff]  ;;  %v852_v28 = vld [vmem:[%s1618_s1 + $0x88] sm:$0xff] }
  0x14   : > { %1070 = vmatpush3.msra.mxu1 %v216_v7  ;;  %1036 = vmatprep.subr.mxu0 %v862_v8  ;;  %v207_v25 = vld [vmem:[%s1618_s1 + $0x18] sm:$0xff]  ;;  %v206_v27 = vld [vmem:[%s1618_s1 + $0x10] sm:$0xff]  ;;  %v205_v29 = vld [vmem:[%s1618_s1 + $0x8] sm:$0xff] }
  0x15   : > { %1071 = vmatprep.subr.mxu1 %v215_v9  ;;  %1037 = vmatpush3.msra.mxu0 %v862_v8  ;;  %v851_v30 = vld [vmem:[%s1618_s1 + $0x80] sm:$0xff]  ;;  %v1403_v34 = vld [vmem:[%s1390_s6 + $0x9] sm:$0xff]  ;;  %v882_v36 = vld [vmem:[%s1618_s1 + $0x178] sm:$0xff] }
  0x16   : > { %1072 = vmatpush3.msra.mxu1 %v215_v9  ;;  %1038 = vmatprep.subr.mxu0 %v861_v10  ;;  %v204_v31 = vld [vmem:[%s1618_s1] sm:$0xff]  ;;  %v199_v35 = vld [vmem:[%s1390_s6 + $0x8] sm:$0xff]  ;;  %v881_v38 = vld [vmem:[%s1618_s1 + $0x170] sm:$0xff] }
  0x17   : > { %1073 = vmatprep.subr.mxu1 %v214_v11  ;;  %1039 = vmatpush3.msra.mxu0 %v861_v10  ;;  %v1399_v32 = vld [vmem:[%s1390_s6 + $0x1] sm:$0xff]  ;;  %v878_v41 = vld [vmem:[%s1618_s1 + $0x158] sm:$0xff]  ;;  %v877_v42 = vld [vmem:[%s1618_s1 + $0x150] sm:$0xff] }
  0x18   : > { %1074 = vmatpush3.msra.mxu1 %v214_v11  ;;  %1040 = vmatprep.subr.mxu0 %v860_v12  ;;  %v198_v33 = vld [vmem:[%s1390_s6] sm:$0xff]  ;;  %v880_v39 = vld [vmem:[%s1618_s1 + $0x168] sm:$0xff]  ;;  %v874_v45 = vld [vmem:[%s1618_s1 + $0x138] sm:$0xff] }
  0x19   : > { %1075 = vmatprep.subr.mxu1 %v213_v13  ;;  %1041 = vmatpush3.msra.mxu0 %v860_v12  ;;  %v202_v37 = vld [vmem:[%s1390_s6 + $0x2] sm:$0xff]  ;;  %v873_v46 = vld [vmem:[%s1618_s1 + $0x130] sm:$0xff]  ;;  %v870_v49 = vld [vmem:[%s1618_s1 + $0x118] sm:$0xff] }
  0x1a   : > { %1076 = vmatpush3.msra.mxu1 %v213_v13  ;;  %1042 = vmatprep.subr.mxu0 %v859_v14  ;;  %v879_v40 = vld [vmem:[%s1618_s1 + $0x160] sm:$0xff]  ;;  %v876_v43 = vld [vmem:[%s1618_s1 + $0x148] sm:$0xff]  ;;  %v869_v50 = vld [vmem:[%s1618_s1 + $0x110] sm:$0xff] }
  0x1b   : > { %1077 = vmatprep.subr.mxu1 %v212_v15  ;;  %1043 = vmatpush3.msra.mxu0 %v859_v14  ;;  %v875_v44 = vld [vmem:[%s1618_s1 + $0x140] sm:$0xff]  ;;  %v872_v47 = vld [vmem:[%s1618_s1 + $0x128] sm:$0xff]  ;;  %v899_v54 = vld [vmem:[%s1619_s2 + $0xf8] sm:$0xff] }
  0x1c   : > { %1078 = vmatpush3.msra.mxu1 %v212_v15  ;;  %1044 = vmatprep.subr.mxu0 %v858_v16  ;;  %v871_v48 = vld [vmem:[%s1618_s1 + $0x120] sm:$0xff]  ;;  %v868_v51 = vld [vmem:[%s1618_s1 + $0x108] sm:$0xff]  ;;  %v898_v55 = vld [vmem:[%s1619_s2 + $0xf0] sm:$0xff] }
  0x1d   : > { %1079 = vmatprep.subr.mxu1 %v211_v17  ;;  %1045 = vmatpush3.msra.mxu0 %v858_v16  ;;  %v867_v52 = vld [vmem:[%s1618_s1 + $0x100] sm:$0xff]  ;;  %v203_v53 = vld [vmem:[%s1390_s6 + $0xa] sm:$0xff]  ;;  %v511_v56 = vld [vmem:[%s1619_s2 + $0x78] sm:$0xff] }
  0x1e   : > { %1080 = vmatpush3.msra.mxu1 %v211_v17  ;;  %1046 = vmatprep.subr.mxu0 %v857_v18  ;;  %v897_v57 = vld [vmem:[%s1619_s2 + $0xe8] sm:$0xff]  ;;  %v510_v58 = vld [vmem:[%s1619_s2 + $0x70] sm:$0xff]  ;;  %v896_v60 = vld [vmem:[%s1619_s2 + $0xe0] sm:$0xff] }
  0x1f   : > { %1081 = vmatprep.subr.mxu1 %v210_v19  ;;  %1047 = vmatpush3.msra.mxu0 %v857_v18  ;;  %v509_v59 = vld [vmem:[%s1619_s2 + $0x68] sm:$0xff]  ;;  %v508_v61 = vld [vmem:[%s1619_s2 + $0x60] sm:$0xff]  ;;  %v895_v62 = vld [vmem:[%s1619_s2 + $0xd8] sm:$0xff] }
  0x20   : > { %1082 = vmatpush3.msra.mxu1 %v210_v19  ;;  %1048 = vmatprep.subr.mxu0 %v856_v20  ;;  %v507_v63 = vld [vmem:[%s1619_s2 + $0x58] sm:$0xff]  ;;  %v894_v0 = vld [vmem:[%s1619_s2 + $0xd0] sm:$0xff]  ;;  %v893_v2 = vld [vmem:[%s1619_s2 + $0xc8] sm:$0xff]  ;;  %v1256_v19 = vmov 0.0  }
  0x21   : > { %1083 = vmatprep.subr.mxu1 %v209_v21  ;;  %1049 = vmatpush3.msra.mxu0 %v856_v20  ;;  %v506_v1 = vld [vmem:[%s1619_s2 + $0x50] sm:$0xff]  ;;  %v505_v3 = vld [vmem:[%s1619_s2 + $0x48] sm:$0xff]  ;;  %v892_v4 = vld [vmem:[%s1619_s2 + $0xc0] sm:$0xff]  ;;  %490 = vst [vmem:[#allocation2] sm:$0x1] %v1256_v19 }
  0x22   : > { %1084 = vmatpush3.msra.mxu1 %v209_v21  ;;  %1050 = vmatprep.subr.mxu0 %v855_v22  ;;  %v891_v5 = vld [vmem:[%s1619_s2 + $0xb8] sm:$0xff]  ;;  %v890_v6 = vld [vmem:[%s1619_s2 + $0xb0] sm:$0xff]  ;;  %v889_v7 = vld [vmem:[%s1619_s2 + $0xa8] sm:$0xff]  ;;  %491 = vst [vmem:[#allocation2 + $0x11] sm:$0x1] %v1256_v19 }
  0x23   : > { %1085 = vmatprep.subr.mxu1 %v208_v23  ;;  %1051 = vmatpush3.msra.mxu0 %v855_v22  ;;  %v888_v8 = vld [vmem:[%s1619_s2 + $0xa0] sm:$0xff]  ;;  %v887_v10 = vld [vmem:[%s1619_s2 + $0x98] sm:$0xff]  ;;  %v886_v12 = vld [vmem:[%s1619_s2 + $0x90] sm:$0xff] }
  0x24   : > { %1086 = vmatpush3.msra.mxu1 %v208_v23  ;;  %1052 = vmatprep.subr.mxu0 %v854_v24  ;;  %v504_v9 = vld [vmem:[%s1619_s2 + $0x40] sm:$0xff]  ;;  %v503_v11 = vld [vmem:[%s1619_s2 + $0x38] sm:$0xff]  ;;  %v502_v13 = vld [vmem:[%s1619_s2 + $0x30] sm:$0xff] }
  0x25   : > { %1087 = vmatprep.subr.mxu1 %v207_v25  ;;  %1053 = vmatpush3.msra.mxu0 %v854_v24  ;;  %v885_v14 = vld [vmem:[%s1619_s2 + $0x88] sm:$0xff]  ;;  %v884_v16 = vld [vmem:[%s1619_s2 + $0x80] sm:$0xff]  ;;  %v915_v18 = vld [vmem:[%s1619_s2 + $0x178] sm:$0xff] }
  0x26   : > { %1088 = vmatpush3.msra.mxu1 %v207_v25  ;;  %1054 = vmatprep.subr.mxu0 %v853_v26  ;;  %v501_v15 = vld [vmem:[%s1619_s2 + $0x28] sm:$0xff]  ;;  %v500_v17 = vld [vmem:[%s1619_s2 + $0x20] sm:$0xff]  ;;  %v499_v20 = vld [vmem:[%s1619_s2 + $0x18] sm:$0xff] }
  0x27   : > { %1089 = vmatprep.subr.mxu1 %v206_v27  ;;  %1055 = vmatpush3.msra.mxu0 %v853_v26  ;;  %v498_v21 = vld [vmem:[%s1619_s2 + $0x10] sm:$0xff]  ;;  %v497_v22 = vld [vmem:[%s1619_s2 + $0x8] sm:$0xff]  ;;  %v496_v23 = vld [vmem:[%s1619_s2] sm:$0xff] }
  0x28   : > { %1090 = vmatpush3.msra.mxu1 %v206_v27  ;;  %1056 = vmatprep.subr.mxu0 %v852_v28 }
  0x29   : > { %1091 = vmatprep.subr.mxu1 %v205_v29  ;;  %1057 = vmatpush3.msra.mxu0 %v852_v28 }
  0x2a   : > { %1092 = vmatpush3.msra.mxu1 %v205_v29  ;;  %1058 = vmatprep.subr.mxu0 %v851_v30 }
  0x2b   : > { %1093 = vmatprep.subr.mxu1 %v204_v31  ;;  %1059 = vmatpush3.msra.mxu0 %v851_v30  ;;  %v883_v30 = vld [vmem:[%s1620_s3] ss:$0 sm:$0xff] }
  0x2c   : > { %1060 = vmatprep.mubr.f32.mxu0 %v1399_v32  ;;  %1094 = vmatpush3.msra.mxu1 %v204_v31 }
  0x2d   : > { %1095 = vmatprep.mubr.f32.mxu1 %v198_v33  ;;  %1061 = vmatmul.mubr.f32.vlgmr.msra.gmra.mxu0 %v1403_v34 }
  0x2e   : > { %1096 = vmatmul.mubr.f32.vlgmr.msra.gmra.mxu1 %v199_v35  ;;  %1098 = vmatprep.subr.mxu0 %v882_v36 }
  0x2f   : > { %1130 = vmatprep.mubr.f32.mxu0 %v202_v37  ;;  %1099 = vmatpush3.msra.mxu0 %v882_v36 }
  0x30   : > { %1100 = vmatprep.subr.mxu0 %v881_v38  ;;  %1133 = vmatprep.subr.mxu1 %v899_v54 }
  0x31   : > { %1101 = vmatpush3.msra.mxu0 %v881_v38  ;;  %1134 = vmatpush3.msra.mxu1 %v899_v54  ;;  %v904_v54 = vld [vmem:[%s1619_s2 + $0x120] sm:$0xff] }
  0x32   : > { %1102 = vmatprep.subr.mxu0 %v880_v39  ;;  %1135 = vmatprep.subr.mxu1 %v898_v55 }
  0x33   : > { %1103 = vmatpush3.msra.mxu0 %v880_v39  ;;  %1136 = vmatpush3.msra.mxu1 %v898_v55  ;;  %v903_v55 = vld [vmem:[%s1619_s2 + $0x118] sm:$0xff] }
  0x34   : > { %1104 = vmatprep.subr.mxu0 %v879_v40  ;;  %1137 = vmatprep.subr.mxu1 %v897_v57 }
  0x35   : > { %1105 = vmatpush3.msra.mxu0 %v879_v40  ;;  %1138 = vmatpush3.msra.mxu1 %v897_v57  ;;  %v901_v57 = vld [vmem:[%s1619_s2 + $0x108] sm:$0xff] }
  0x36   : > { %1106 = vmatprep.subr.mxu0 %v878_v41  ;;  %1139 = vmatprep.subr.mxu1 %v896_v60 }
  0x37   : > { %1107 = vmatpush3.msra.mxu0 %v878_v41  ;;  %1140 = vmatpush3.msra.mxu1 %v896_v60  ;;  %v914_v41 = vld [vmem:[%s1619_s2 + $0x170] sm:$0xff] }
  0x38   : > { %1108 = vmatprep.subr.mxu0 %v877_v42  ;;  %1141 = vmatprep.subr.mxu1 %v895_v62 }
  0x39   : > { %1109 = vmatpush3.msra.mxu0 %v877_v42  ;;  %1142 = vmatpush3.msra.mxu1 %v895_v62  ;;  %v913_v42 = vld [vmem:[%s1619_s2 + $0x168] sm:$0xff] }
  0x3a   : > { %1110 = vmatprep.subr.mxu0 %v876_v43  ;;  %1143 = vmatprep.subr.mxu1 %v894_v0 }
  0x3b   : > { %1111 = vmatpush3.msra.mxu0 %v876_v43  ;;  %1144 = vmatpush3.msra.mxu1 %v894_v0  ;;  %v912_v43 = vld [vmem:[%s1619_s2 + $0x160] sm:$0xff] }
  0x3c   : > { %1112 = vmatprep.subr.mxu0 %v875_v44  ;;  %1145 = vmatprep.subr.mxu1 %v893_v2 }
  0x3d   : > { %1113 = vmatpush3.msra.mxu0 %v875_v44  ;;  %1146 = vmatpush3.msra.mxu1 %v893_v2  ;;  %v911_v44 = vld [vmem:[%s1619_s2 + $0x158] sm:$0xff]  ;;  %v916_v2 = vld [vmem:[%s1620_s3 + $0x1] ss:$0 sm:$0xff] }
  0x3e   : > { %1114 = vmatprep.subr.mxu0 %v874_v45  ;;  %1147 = vmatprep.subr.mxu1 %v892_v4 }
  0x3f   : > { %1115 = vmatpush3.msra.mxu0 %v874_v45  ;;  %1148 = vmatpush3.msra.mxu1 %v892_v4 }
  0x40   : > { %1116 = vmatprep.subr.mxu0 %v873_v46  ;;  %1149 = vmatprep.subr.mxu1 %v891_v5 }
  0x41   : > { %1117 = vmatpush3.msra.mxu0 %v873_v46  ;;  %1150 = vmatpush3.msra.mxu1 %v891_v5 }
  0x42   : > { %1118 = vmatprep.subr.mxu0 %v872_v47  ;;  %1151 = vmatprep.subr.mxu1 %v890_v6 }
  0x43   : > { %1119 = vmatpush3.msra.mxu0 %v872_v47  ;;  %1152 = vmatpush3.msra.mxu1 %v890_v6 }
  0x44   : > { %1120 = vmatprep.subr.mxu0 %v871_v48  ;;  %1153 = vmatprep.subr.mxu1 %v889_v7 }
  0x45   : > { %1121 = vmatpush3.msra.mxu0 %v871_v48  ;;  %1154 = vmatpush3.msra.mxu1 %v889_v7  ;;  %v910_v48 = vld [vmem:[%s1619_s2 + $0x150] sm:$0xff] }
  0x46   : > { %1122 = vmatprep.subr.mxu0 %v870_v49  ;;  %1155 = vmatprep.subr.mxu1 %v888_v8 }
  0x47   : > { %1123 = vmatpush3.msra.mxu0 %v870_v49  ;;  %1156 = vmatpush3.msra.mxu1 %v888_v8  ;;  %v909_v49 = vld [vmem:[%s1619_s2 + $0x148] sm:$0xff] }
  0x48   : > { %1124 = vmatprep.subr.mxu0 %v869_v50  ;;  %1157 = vmatprep.subr.mxu1 %v887_v10 }
  0x49   : > { %1125 = vmatpush3.msra.mxu0 %v869_v50  ;;  %1158 = vmatpush3.msra.mxu1 %v887_v10  ;;  %v908_v50 = vld [vmem:[%s1619_s2 + $0x140] sm:$0xff] }
  0x4a   : > { %1126 = vmatprep.subr.mxu0 %v868_v51  ;;  %1159 = vmatprep.subr.mxu1 %v886_v12 }
  0x4b   : > { %1127 = vmatpush3.msra.mxu0 %v868_v51  ;;  %1160 = vmatpush3.msra.mxu1 %v886_v12  ;;  %v907_v51 = vld [vmem:[%s1619_s2 + $0x138] sm:$0xff] }
  0x4c   : > { %1128 = vmatprep.subr.mxu0 %v867_v52  ;;  %1161 = vmatprep.subr.mxu1 %v885_v14 }
  0x4d   : > { %1129 = vmatpush3.msra.mxu0 %v867_v52  ;;  %1162 = vmatpush3.msra.mxu1 %v885_v14  ;;  %v906_v52 = vld [vmem:[%s1619_s2 + $0x130] sm:$0xff] }
  0x4e   : > { %1131 = vmatmul.mubr.f32.vlgmr.msra.gmra.mxu0 %v203_v53  ;;  %1168 = vmatprep.subr.mxu0 %v511_v56  ;;  %v905_v53 = vld [vmem:[%s1619_s2 + $0x128] sm:$0xff] }
  0x4f   : > { %1169 = vmatpush3.msra.mxu0 %v511_v56  ;;  %1163 = vmatprep.subr.mxu1 %v884_v16  ;;  %v902_v56 = vld [vmem:[%s1619_s2 + $0x110] sm:$0xff] }
  0x50   : > { %1170 = vmatprep.subr.mxu0 %v510_v58  ;;  %1164 = vmatpush3.msra.mxu1 %v884_v16 }
  0x51   : > { %1171 = vmatpush3.msra.mxu0 %v510_v58  ;;  %1203 = vmatprep.subr.mxu1 %v915_v18  ;;  %v900_v58 = vld [vmem:[%s1619_s2 + $0x100] sm:$0xff] }
  0x52   : > { %1172 = vmatprep.subr.mxu0 %v509_v59 }
  0x53   : > { %1173 = vmatpush3.msra.mxu0 %v509_v59 }
  0x54   : > { %1174 = vmatprep.subr.mxu0 %v508_v61 }
  0x55   : > { %1175 = vmatpush3.msra.mxu0 %v508_v61 }
  0x56   : > { %1176 = vmatprep.subr.mxu0 %v507_v63 }
  0x57   : > { %1177 = vmatpush3.msra.mxu0 %v507_v63 }
  0x58   : > { %1178 = vmatprep.subr.mxu0 %v506_v1 }
  0x59   : > { %1179 = vmatpush3.msra.mxu0 %v506_v1 }
  0x5a   : > { %1180 = vmatprep.subr.mxu0 %v505_v3 }
  0x5b   : > { %1181 = vmatpush3.msra.mxu0 %v505_v3 }
  0x5c   : > { %1182 = vmatprep.subr.mxu0 %v504_v9 }
  0x5d   : > { %1183 = vmatpush3.msra.mxu0 %v504_v9 }
  0x5e   : > { %1184 = vmatprep.subr.mxu0 %v503_v11 }
  0x5f   : > { %1185 = vmatpush3.msra.mxu0 %v503_v11 }
  0x60   : > { %1186 = vmatprep.subr.mxu0 %v502_v13 }
  0x61   : > { %1187 = vmatpush3.msra.mxu0 %v502_v13 }
  0x62   : > { %1188 = vmatprep.subr.mxu0 %v501_v15 }
  0x63   : > { %1189 = vmatpush3.msra.mxu0 %v501_v15 }
  0x64   : > { %1190 = vmatprep.subr.mxu0 %v500_v17 }
  0x65   : > { %1191 = vmatpush3.msra.mxu0 %v500_v17 }
  0x66   : > { %1192 = vmatprep.subr.mxu0 %v499_v20 }
  0x67   : > { %1193 = vmatpush3.msra.mxu0 %v499_v20 }
  0x68   : > { %1194 = vmatprep.subr.mxu0 %v498_v21 }
  0x69   : > { %1195 = vmatpush3.msra.mxu0 %v498_v21 }
  0x6a   : > { %1196 = vmatprep.subr.mxu0 %v497_v22 }
  0x6b   : > { %1197 = vmatpush3.msra.mxu0 %v497_v22 }
  0x6c   : > { %1198 = vmatprep.subr.mxu0 %v496_v23 }
  0x6d   : > { %1199 = vmatpush3.msra.mxu0 %v496_v23 }
  0xed   : > { %v1062_v24 = vpop.f32.mrf.mxu0 }
  0xee   : > { %v1097_v25 = vpop.f32.mrf.mxu1 }
  0xef   : > { %v303_v26 = vpop.f32.mrf.mxu0  ;;  %v384_v28 = vadd.f32 %v1097_v25, %v1062_v24 }
  0xf0   : > { %v378_v27 = vpop.f32.mrf.mxu1 }
  0xf1   : > { %v379_v31 = vadd.f32 %v378_v27, %v303_v26 }
 0x10e   : > { %v1132_v29 = vpop.f32.mrf.mxu0 }
 0x10f   : > { %v480_v33 = vadd.f32 %v1132_v29, %v384_v28 }
 0x110   : > { %v470_v35 = vpop.f32.mrf.mxu0 }
 0x111   : > { %v487_v36 = vadd.f32 %v883_v30, %v480_v33  ;;  %v479_v37 = vadd.f32 %v470_v35, %v379_v31 }
 0x113   : > { %v489_v38 = vmax.f32 %v487_v36, 0.0  ;;  %v486_v39 = vadd.f32 %v883_v30, %v479_v37 }
 0x115   : > { %493 = vst [vmem:[#allocation2 + $0x9] sm:$0xff] %v489_v38  ;;  %v488_v40 = vmax.f32 %v486_v39, 0.0 }
 0x117   : > { %492 = vst [vmem:[#allocation2 + $0x1] sm:$0xff] %v488_v40  ;;  %1165 = vmatprep.mubr.f32.mxu1 %v488_v40 }
 0x118   : > { %1166 = vmatmul.mubr.f32.vlgmr.msra.gmra.mxu1 %v489_v38 }
 0x119   : > { %1204 = vmatpush3.msra.mxu1 %v915_v18 }
 0x11a   : > { %1205 = vmatprep.subr.mxu1 %v914_v41 }
 0x11b   : > { %1206 = vmatpush3.msra.mxu1 %v914_v41 }
 0x11c   : > { %1207 = vmatprep.subr.mxu1 %v913_v42  ;;  %v680_v59 = vld [vmem:[#allocation2 + $0xa] sm:$0xff] }
 0x11d   : > { %1208 = vmatpush3.msra.mxu1 %v913_v42 }
 0x11e   : > { %1209 = vmatprep.subr.mxu1 %v912_v43  ;;  %v494_v45 = vld [vmem:[#allocation2] sm:$0xff]  ;;  %v495_v47 = vld [vmem:[#allocation2 + $0x8] sm:$0xff] }
 0x11f   : > { %v679_v46 = vld [vmem:[#allocation2 + $0x2] sm:$0xff]  ;;  %1210 = vmatpush3.msra.mxu1 %v912_v43  ;;  %1200 = vmatprep.mubr.f32.mxu0 %v494_v45 }
 0x120   : > { %1211 = vmatprep.subr.mxu1 %v911_v44  ;;  %1235 = vmatprep.mubr.f32.mxu1 %v679_v46 }
 0x121   : > { %1201 = vmatmul.mubr.f32.vlgmr.msra.gmra.mxu0 %v495_v47  ;;  %1212 = vmatpush3.msra.mxu1 %v911_v44 }
 0x122   : > { %1213 = vmatprep.subr.mxu1 %v910_v48 }
 0x123   : > { %1214 = vmatpush3.msra.mxu1 %v910_v48 }
 0x124   : > { %1215 = vmatprep.subr.mxu1 %v909_v49 }
 0x125   : > { %1216 = vmatpush3.msra.mxu1 %v909_v49 }
 0x126   : > { %1217 = vmatprep.subr.mxu1 %v908_v50 }
 0x127   : > { %1218 = vmatpush3.msra.mxu1 %v908_v50 }
 0x128   : > { %1219 = vmatprep.subr.mxu1 %v907_v51 }
 0x129   : > { %1220 = vmatpush3.msra.mxu1 %v907_v51 }
 0x12a   : > { %1221 = vmatprep.subr.mxu1 %v906_v52 }
 0x12b   : > { %1222 = vmatpush3.msra.mxu1 %v906_v52 }
 0x12c   : > { %1223 = vmatprep.subr.mxu1 %v905_v53 }
 0x12d   : > { %1224 = vmatpush3.msra.mxu1 %v905_v53 }
 0x12e   : > { %1225 = vmatprep.subr.mxu1 %v904_v54 }
 0x12f   : > { %1226 = vmatpush3.msra.mxu1 %v904_v54 }
 0x130   : > { %1227 = vmatprep.subr.mxu1 %v903_v55 }
 0x131   : > { %1228 = vmatpush3.msra.mxu1 %v903_v55 }
 0x132   : > { %1229 = vmatprep.subr.mxu1 %v902_v56 }
 0x133   : > { %1230 = vmatpush3.msra.mxu1 %v902_v56 }
 0x134   : > { %1231 = vmatprep.subr.mxu1 %v901_v57 }
 0x135   : > { %1232 = vmatpush3.msra.mxu1 %v901_v57 }
 0x136   : > { %1233 = vmatprep.subr.mxu1 %v900_v58 }
 0x137   : > { %1234 = vmatpush3.msra.mxu1 %v900_v58 }
 0x138   : > { %1236 = vmatmul.mubr.f32.vlgmr.msra.gmra.mxu1 %v680_v59 }
 0x1d8   : > { %v1167_v60 = vpop.f32.mrf.mxu1 }
 0x1da   : > { %v595_v62 = vpop.f32.mrf.mxu1 }
 0x1e1   : > { %v1202_v61 = vpop.f32.mrf.mxu0 }
 0x1e2   : > { %v676_v0 = vadd.f32 %v1202_v61, %v1167_v60 }
 0x1e3   : > { %v670_v63 = vpop.f32.mrf.mxu0 }
 0x1e4   : > { %v671_v3 = vadd.f32 %v670_v63, %v595_v62 }
 0x1f8   : > { %v1237_v1 = vpop.f32.mrf.mxu1 }
 0x1f9   : > { %v774_v4 = vadd.f32 %v1237_v1, %v676_v0 }
 0x1fa   : > { %v764_v5 = vpop.f32.mrf.mxu1 }
 0x1fb   : > { %v781_v6 = vadd.f32 %v916_v2, %v774_v4  ;;  %v773_v7 = vadd.f32 %v764_v5, %v671_v3 }
 0x1fd   : > { %v783_v8 = vadd.f32 %v781_v6, %v1403_v34  ;;  %v780_v9 = vadd.f32 %v916_v2, %v773_v7 }
 0x1ff   : > { %v785_v10 = vmax.f32 %v783_v8, 0.0  ;;  %v782_v11 = vadd.f32 %v780_v9, %v1399_v32 }
 0x201   : > { %787 = vst [vmem:[%s197_s29 + $0x8] sm:$0xff] %v785_v10  ;;  %v784_v12 = vmax.f32 %v782_v11, 0.0 }
 0x203   : > { %786 = vst [vmem:[%s197_s29] sm:$0xff] %v784_v12 }
 0x204 PF: > { %s14_s15 = sadd.s32 1, %s1254_s15  }
 0x205   : > { %p11_p4 = scmp.ge.s32.totalorder %s14_s15, 4  }
 0x207   :  { %13 = sbr.rel (!%p11_p4) target bundleno = 1 (0x1), region = 70 }

</bundles_post_ra>
